<compile_context>
chip_gen: v5e
topology: v5e:2x2
jax: 0.10.0
libtpu: 0.0.40
codegen_flags: <defaults>
</compile_context>

<pallas_src>
import functools

import jax
import jax.numpy as jnp
from jax.experimental import pallas as pl
from jax.experimental.pallas import tpu as pltpu


# ----------------------------- config helpers --------------------------------

def _round_up(x, d):
    return (x + d - 1) // d * d


@functools.lru_cache(maxsize=1)
def _tpu_config():
    """(max_row_tile_for_1x1, vmem_limit_bytes) tuned per TPU generation.

    v5e/v6e have 128 MiB VMEM -> bigger row tiles + higher scoped-VMEM cap;
    v7x has 64 MiB per TensorCore -> stay at 512 rows / 40 MiB.
    """
    vmem_cap = 64 * 1024 * 1024            # conservative default (v7x-sized)
    try:
        info = pltpu.get_tpu_info()
        vmem_cap = int(getattr(info, "vmem_capacity_bytes", vmem_cap))
    except Exception:
        pass
    if vmem_cap >= 96 * 1024 * 1024:       # v5e / v6e (128 MiB physical VMEM)
        return 1024, 64 * 1024 * 1024
    return 512, 40 * 1024 * 1024           # v7x (64 MiB per TensorCore)


def _pick_row_tile(m, max_tile):
    """Largest multiple-of-16 divisor of m that is <= max_tile; else pad m."""
    best = None
    for t in range(16, min(m, max_tile) + 1, 16):
        if m % t == 0:
            best = t
    if best is not None:
        return best, m
    tm = min(max_tile, _round_up(m, 16))
    return tm, _round_up(m, tm)


def _pick_h_tile(hout, wout, max_m=1024):
    """Largest divisor th of hout with th*wout <= max_m (prefer th*wout % 8 == 0).

    Sizes the 3x3-conv row tile by matmul M (th*wout) instead of a fixed row
    count, so late ResNet stages process the whole feature map per grid step.
    """
    best, best_aligned = 1, None
    for t in range(1, hout + 1):
        if hout % t or (t * wout > max_m and t > 1):
            continue
        best = t
        if (t * wout) % 8 == 0:
            best_aligned = t
    return best_aligned if best_aligned is not None else best


# ----------------------------- Pallas kernels -------------------------------

def _mm_bias_kernel(x_ref, w_ref, b_ref, o_ref, *, apply_relu):
    """1x1 conv as a channel matmul (bf16 MXU, f32 acc) + bias (+ReLU)."""
    acc = jnp.dot(x_ref[...], w_ref[...], preferred_element_type=jnp.float32)
    out = acc + b_ref[...]
    if apply_relu:
        out = jnp.maximum(out, 0.0)
    o_ref[...] = out.astype(o_ref.dtype)


def _mm_bias_add_relu_kernel(x_ref, w_ref, b_ref, r_ref, o_ref):
    """1x1 conv + bias + residual add + ReLU (bottleneck tail, fully fused)."""
    acc = jnp.dot(x_ref[...], w_ref[...], preferred_element_type=jnp.float32)
    out = acc + b_ref[...] + r_ref[...].astype(jnp.float32)
    o_ref[...] = jnp.maximum(out, 0.0).astype(o_ref.dtype)


def _conv3x3_bias_relu_kernel(x_ref, w_ref, b_ref, o_ref, pad_ref, acc_ref, *,
                              stride, th, wout):
    """3x3 conv (padding=1) + folded-BN bias + ReLU for one (batch, row-tile).

    x_ref:   (H, W, Cin)       un-padded image of one batch element (bf16)
    w_ref:   stride==1: (3, 3*Cin, Cout)   kx folded into the contraction
             stride>1 : (9, Cin, Cout)     one tap per matmul
    b_ref:   (1, Cout)         f32 folded-BN bias
    o_ref:   (th*wout, Cout)   lane-dense flat output rows of this tile
    pad_ref: (H+2, W+2, Cin)   VMEM scratch, zero-padded image (filled at r==0)
    acc_ref: (th*wout, Cout)   VMEM f32 accumulator
    """
    h, w, cin = x_ref.shape
    r = pl.program_id(1)

    # Build the zero-padded image in VMEM once per batch element.  This
    # replaces the wrapper-side jnp.pad (a full extra HBM read+write pass).
    @pl.when(r == 0)
    def _():
        pad_ref[...] = jnp.zeros_like(pad_ref)
        pad_ref[1:h + 1, 1:w + 1, :] = x_ref[...]

    row0 = pl.multiple_of(r * (th * stride), th * stride)

    if stride == 1:
        # kx taps folded into the contraction: 3 matmuls with K = 3*Cin,
        # taps sliced directly from the padded VMEM ref (no slab copy).
        for ky in range(3):
            rows = pad_ref[pl.ds(row0 + ky, th), :, :]          # (th, W+2, Cin)
            win = jnp.concatenate(
                [rows[:, kx:kx + wout, :] for kx in range(3)], axis=-1)
            part = jnp.dot(win.reshape(th * wout, 3 * cin), w_ref[ky],
                           preferred_element_type=jnp.float32)
            if ky == 0:
                acc_ref[...] = part
            else:
                acc_ref[...] += part
    else:
        # TODO(synk): stride>1 keeps the 9-tap strided-window path (small
        # in-kernel copies); a polyphase / space-to-batch layout would make
        # every tap a unit-stride slice.
        slab_len = (th - 1) * stride + 3
        slab = pad_ref[pl.ds(row0, slab_len), :, :]
        for t in range(9):
            ky, kx = divmod(t, 3)
            win = jax.lax.slice(
                slab, (ky, kx, 0),
                (ky + (th - 1) * stride + 1, kx + (wout - 1) * stride + 1, cin),
                (stride, stride, 1))
            part = jnp.dot(win.reshape(th * wout, cin), w_ref[t],
                           preferred_element_type=jnp.float32)
            if t == 0:
                acc_ref[...] = part
            else:
                acc_ref[...] += part

    out = jnp.maximum(acc_ref[...] + b_ref[...], 0.0)
    o_ref[...] = out.astype(o_ref.dtype)


# ------------------------------- wrappers ------------------------------------

def conv1x1(x_nhwc, w, bias, *, relu=True, residual=None,
            out_dtype=jnp.bfloat16):
    """1x1 conv (+ folded BN bias) (+ residual add + ReLU) via Pallas matmul.

    When `residual` is given the ReLU is always applied (bottleneck tail
    semantics) and `relu` is ignored.
    """
    n, h, wsp, cin = x_nhwc.shape
    cout = w.shape[1]
    m = n * h * wsp
    max_tm, vmem_limit = _tpu_config()

    x2 = x_nhwc.reshape(m, cin)
    b2 = bias.reshape(1, cout).astype(jnp.float32)
    r2 = None if residual is None else residual.reshape(m, cout)

    tm, m_pad = _pick_row_tile(m, max_tm)
    if m_pad != m:
        x2 = jnp.pad(x2, ((0, m_pad - m), (0, 0)))
        if r2 is not None:
            r2 = jnp.pad(r2, ((0, m_pad - m), (0, 0)))

    in_specs = [
        pl.BlockSpec((tm, cin), lambda i: (i, 0)),
        pl.BlockSpec((cin, cout), lambda i: (0, 0)),
        pl.BlockSpec((1, cout), lambda i: (0, 0)),
    ]
    args = [x2, w, b2]
    if residual is None:
        kernel = functools.partial(_mm_bias_kernel, apply_relu=relu)
    else:
        in_specs.append(pl.BlockSpec((tm, cout), lambda i: (i, 0)))
        args.append(r2)
        kernel = _mm_bias_add_relu_kernel

    out_itemsize = jnp.dtype(out_dtype).itemsize
    flops = 2 * m_pad * cin * cout
    bytes_accessed = (m_pad * cin * x2.dtype.itemsize
                      + cin * cout * w.dtype.itemsize
                      + cout * 4
                      + m_pad * cout * out_itemsize)
    if r2 is not None:
        bytes_accessed += m_pad * cout * r2.dtype.itemsize

    out = pl.pallas_call(
        kernel,
        out_shape=jax.ShapeDtypeStruct((m_pad, cout), out_dtype),
        grid=(m_pad // tm,),
        in_specs=in_specs,
        out_specs=pl.BlockSpec((tm, cout), lambda i: (i, 0)),
        compiler_params=pltpu.CompilerParams(
            dimension_semantics=("parallel",),
            vmem_limit_bytes=vmem_limit),
        cost_estimate=pl.CostEstimate(flops=flops, transcendentals=0,
                                      bytes_accessed=bytes_accessed),
    )(*args)

    if m_pad != m:
        out = out[:m]
    return out.reshape(n, h, wsp, cout)


def shortcut_conv1x1(x_nhwc, w, bias, *, stride):
    """Projection shortcut: 1x1 conv (stride s) + folded BN, no ReLU."""
    if stride != 1:
        # TODO(synk): the spatial subsample is still a wrapper-side XLA slice
        # (one extra HBM pass over the block input); folding it into the
        # kernel (strided slab loads / polyphase) is not implemented.
        x_nhwc = x_nhwc[:, ::stride, ::stride, :]
    return conv1x1(x_nhwc, w, bias, relu=False)


def conv3x3(x_nhwc, w2, bias, *, stride=1):
    """3x3 conv (padding=1) + folded BN bias + ReLU, tiled over (batch, rows)."""
    n, h, wsp, cin = x_nhwc.shape
    cout = w2.shape[-1]
    hout = (h + 2 - 3) // stride + 1
    wout = (wsp + 2 - 3) // stride + 1
    _, vmem_limit = _tpu_config()

    th = _pick_h_tile(hout, wout)
    n_rt = hout // th
    b2 = bias.reshape(1, cout).astype(jnp.float32)

    if stride == 1:
        assert w2.shape == (3, 3 * cin, cout), w2.shape
        w_spec = pl.BlockSpec((3, 3 * cin, cout), lambda b, r: (0, 0, 0))
    else:
        assert w2.shape == (9, cin, cout), w2.shape
        w_spec = pl.BlockSpec((9, cin, cout), lambda b, r: (0, 0, 0))

    kernel = functools.partial(_conv3x3_bias_relu_kernel,
                               stride=stride, th=th, wout=wout)

    flops = 2 * n * hout * wout * 9 * cin * cout
    bytes_accessed = (n * h * wsp * cin * x_nhwc.dtype.itemsize
                      + w2.size * w2.dtype.itemsize
                      + cout * 4
                      + n * hout * wout * cout * 2)

    out = pl.pallas_call(
        kernel,
        # Lane-dense flat output: one (th*wout, Cout) slab per grid step.
        out_shape=jax.ShapeDtypeStruct((n * n_rt, th * wout, cout),
                                       jnp.bfloat16),
        grid=(n, n_rt),
        in_specs=[
            # Full (un-padded) image of one batch element; constant across the
            # row axis so it is DMA'd once per batch element and reused.
            pl.BlockSpec((None, h, wsp, cin), lambda b, r: (b, 0, 0, 0)),
            w_spec,
            pl.BlockSpec((1, cout), lambda b, r: (0, 0)),
        ],
        out_specs=pl.BlockSpec((None, th * wout, cout),
                               lambda b, r: (b * n_rt + r, 0, 0)),
        scratch_shapes=[
            pltpu.VMEM((h + 2, wsp + 2, cin), x_nhwc.dtype),   # padded image
            pltpu.VMEM((th * wout, cout), jnp.float32),        # f32 accumulator
        ],
        compiler_params=pltpu.CompilerParams(
            # The row axis must stay on one core ("arbitrary"): the padded
            # image scratch is filled at r == 0 and reused by later row tiles.
            dimension_semantics=("parallel", "arbitrary"),
            vmem_limit_bytes=vmem_limit),
        cost_estimate=pl.CostEstimate(flops=flops, transcendentals=0,
                                      bytes_accessed=bytes_accessed),
    )(x_nhwc, w2, b2)
    return out.reshape(n, hout, wout, cout)


def bottleneck_forward(p, x_nchw, stride):
    """Forward matching the PyTorch Bottleneck module (NCHW in / NCHW out)."""
    # TODO(synk): the NCHW<->NHWC transposes are kept only to match the
    # PyTorch interface; a multi-block network should stay NHWC end-to-end.
    x = jnp.transpose(x_nchw, (0, 2, 3, 1)).astype(jnp.bfloat16)     # -> NHWC bf16
    out = conv1x1(x, p['w1'], p['b1'], relu=True)                    # conv1+bn1+relu
    out = conv3x3(out, p['w2'], p['b2'], stride=stride)              # conv2+bn2+relu
    if 'ws' in p:
        sc = shortcut_conv1x1(x, p['ws'], p['bs'], stride=stride)    # shortcut conv+bn
    else:
        sc = x                                                       # identity shortcut
    out = conv1x1(out, p['w3'], p['b3'], relu=False, residual=sc,
                  out_dtype=jnp.bfloat16)                            # conv3+bn3+add+relu
    return jnp.transpose(out, (0, 3, 1, 2))                          # -> NCHW (bf16)


# --------------------------- parameter construction --------------------------

def _fold_bn(gamma, beta, mean, var, eps=1e-5):
    scale = gamma / jnp.sqrt(var + eps)
    bias = beta - mean * scale
    return scale, bias


def _bn_raw(key, c):
    k1, k2, k3, k4 = jax.random.split(key, 4)
    gamma = jax.random.uniform(k1, (c,), jnp.float32, 0.5, 1.5)
    beta = 0.1 * jax.random.normal(k2, (c,), jnp.float32)
    mean = 0.1 * jax.random.normal(k3, (c,), jnp.float32)
    var = jax.random.uniform(k4, (c,), jnp.float32, 0.5, 1.5)
    return gamma, beta, mean, var


def make_params(key, in_planes, planes, stride):
    exp = 4
    ks = jax.random.split(key, 8)
    p = {}

    w1 = 0.1 * jax.random.normal(ks[0], (planes, in_planes, 1, 1), jnp.float32)
    w2 = 0.1 * jax.random.normal(ks[1], (planes, planes, 3, 3), jnp.float32)
    w3 = 0.1 * jax.random.normal(ks[2], (exp * planes, planes, 1, 1), jnp.float32)

    s1, b1 = _fold_bn(*_bn_raw(ks[3], planes))
    s2, b2 = _fold_bn(*_bn_raw(ks[4], planes))
    s3, b3 = _fold_bn(*_bn_raw(ks[5], exp * planes))
    p['b1'], p['b2'], p['b3'] = b1, b2, b3

    # Fold the BN scale into the conv weights (scale acts on output channels).
    w1s = w1 * s1[:, None, None, None]
    w2s = w2 * s2[:, None, None, None]
    w3s = w3 * s3[:, None, None, None]
    p['w1_scaled_oihw'], p['w2_scaled_oihw'], p['w3_scaled_oihw'] = w1s, w2s, w3s

    # Kernel layouts in bf16.
    p['w1'] = w1s[:, :, 0, 0].T.astype(jnp.bfloat16)                  # (Cin, Cout)
    w2_t = jnp.transpose(w2s, (2, 3, 1, 0))                           # (ky, kx, Cin, Cout)
    if stride == 1:
        # kx folded into the contraction dim: (3, 3*Cin, Cout).
        p['w2'] = w2_t.reshape(3, 3 * planes, planes).astype(jnp.bfloat16)
    else:
        p['w2'] = w2_t.reshape(9, planes, planes).astype(jnp.bfloat16)
    p['w3'] = w3s[:, :, 0, 0].T.astype(jnp.bfloat16)

    if stride != 1 or in_planes != exp * planes:
        ws = 0.1 * jax.random.normal(ks[6], (exp * planes, in_planes, 1, 1),
                                     jnp.float32)
        ss, bs = _fold_bn(*_bn_raw(ks[7], exp * planes))
        wss = ws * ss[:, None, None, None]
        p['ws_scaled_oihw'] = wss
        p['bs'] = bs
        p['ws'] = wss[:, :, 0, 0].T.astype(jnp.bfloat16)
    return p


# --------------------------- pure-JAX reference ------------------------------

def _ref_forward(p, x_nhwc, stride):
    """Reference with the same precision policy (bf16 matmul inputs, f32 acc)."""
    def bconv(x, w_oihw, strd, pad):
        w = jnp.transpose(w_oihw, (2, 3, 1, 0))
        xb = x.astype(jnp.bfloat16).astype(jnp.float32)
        wb = w.astype(jnp.bfloat16).astype(jnp.float32)
        return jax.lax.conv_general_dilated(
            xb, wb, (strd, strd), pad,
            dimension_numbers=('NHWC', 'HWIO', 'NHWC'),
            precision=jax.lax.Precision.HIGHEST)

    out = jax.nn.relu(bconv(x_nhwc, p['w1_scaled_oihw'], 1, 'VALID') + p['b1'])
    out = jax.nn.relu(
        bconv(out, p['w2_scaled_oihw'], stride, ((1, 1), (1, 1))) + p['b2'])
    main = bconv(out, p['w3_scaled_oihw'], 1, 'VALID') + p['b3']
    if 'ws_scaled_oihw' in p:
        sc = bconv(x_nhwc, p['ws_scaled_oihw'], stride, 'VALID') + p['bs']
    else:
        sc = x_nhwc
    sc = sc.astype(jnp.bfloat16).astype(jnp.float32)   # stored as bf16 in kernel path
    return jax.nn.relu(main + sc)


# ------------------------------------ main -----------------------------------

def _check(params, x_nchw, stride, tol=5e-2):
    out = jax.block_until_ready(bottleneck_forward(params, x_nchw, stride))
    x_nhwc = jnp.transpose(x_nchw, (0, 2, 3, 1))
    ref = jnp.transpose(_ref_forward(params, x_nhwc, stride), (0, 3, 1, 2))
    assert out.shape == ref.shape, (out.shape, ref.shape)
    # Tolerance accounts for bf16 storage of intermediates AND of the block
    # output (kernel path) vs the f32 reference.
    err = float(jnp.max(jnp.abs(out.astype(jnp.float32) - ref)))
    assert err < tol, err
    return err


if __name__ == "__main__":
    key = jax.random.PRNGKey(0)
    kx1, kx2, kp1, kp2 = jax.random.split(key, 4)

    N, H, W, planes = 2, 8, 8, 8

    # (a) Projection shortcut: in_planes != expansion*planes, stride = 1.
    in_a, stride_a = 16, 1
    x_a = jax.random.normal(kx1, (N, in_a, H, W), jnp.float32)
    p_a = make_params(kp1, in_a, planes, stride_a)
    err_a = _check(p_a, x_a, stride_a)

    # (b) Identity shortcut: in_planes == expansion*planes, stride = 1.
    in_b, stride_b = 32, 1
    x_b = jax.random.normal(kx2, (N, in_b, H, W), jnp.float32)
    p_b = make_params(kp2, in_b, planes, stride_b)
    err_b = _check(p_b, x_b, stride_b)

    print("KERNEL_OK")
</pallas_src>

<mosaic_0001>
module attributes {stable_mosaic.version = 11 : i64} {
  func.func @_mm_bias_kernel(%arg0: i32, %arg1: memref<128x16xbf16, #tpu.memory_space<vmem>>, %arg2: memref<16x8xbf16, #tpu.memory_space<vmem>>, %arg3: memref<1x8xf32, #tpu.memory_space<vmem>>, %arg4: memref<128x8xbf16, #tpu.memory_space<vmem>>) attributes {dimension_semantics = [#tpu.dimension_semantics<parallel>], iteration_bounds = array<i64: 1>, scalar_prefetch = 0 : i64, scratch_operands = 0 : i64, tpu.core_type = #tpu.core_type<tc>, window_params = [{transform_indices = @transform_0, window_bounds = array<i64: 128, 16>}, {pipeline_mode = #tpu.pipeline_mode<synchronous>, transform_indices = @transform_1, window_bounds = array<i64: 16, 8>}, {pipeline_mode = #tpu.pipeline_mode<synchronous>, transform_indices = @transform_2, window_bounds = array<i64: 1, 8>}, {transform_indices = @transform_3, window_bounds = array<i64: 128, 8>}]} {
    %c0 = arith.constant 0 : index
    %c0_0 = arith.constant 0 : index
    %0 = vector.load %arg1[%c0, %c0_0] : memref<128x16xbf16, #tpu.memory_space<vmem>>, vector<128x16xbf16>
    %c0_1 = arith.constant 0 : index
    %c0_2 = arith.constant 0 : index
    %1 = vector.load %arg2[%c0_1, %c0_2] : memref<16x8xbf16, #tpu.memory_space<vmem>>, vector<16x8xbf16>
    %cst = arith.constant dense<0.000000e+00> : vector<128x8xf32>
    %2 = tpu.matmul %0, %1, %cst {dimension_numbers = #tpu.dot_dimension_numbers<[1], [0], [0], [1], [0, 0, 1, 1], [], []>} : vector<128x16xbf16>, vector<16x8xbf16>, vector<128x8xf32> -> vector<128x8xf32>
    %c0_3 = arith.constant 0 : index
    %c0_4 = arith.constant 0 : index
    %3 = vector.load %arg3[%c0_3, %c0_4] : memref<1x8xf32, #tpu.memory_space<vmem>>, vector<1x8xf32>
    %4 = vector.broadcast %3 : vector<1x8xf32> to vector<128x8xf32>
    %5 = arith.addf %2, %4 : vector<128x8xf32>
    %cst_5 = arith.constant 0.000000e+00 : f32
    %6 = vector.broadcast %cst_5 : f32 to vector<128x8xf32>
    %7 = arith.maximumf %5, %6 : vector<128x8xf32>
    %8 = arith.truncf %7 : vector<128x8xf32> to vector<128x8xbf16>
    %c0_6 = arith.constant 0 : index
    %c0_7 = arith.constant 0 : index
    %9 = vector.load %arg4[%c0_6, %c0_7] : memref<128x8xbf16, #tpu.memory_space<vmem>>, vector<128x8xbf16>
    tpu.vector_store %arg4[%c0_6, %c0_7], %8 {strides = array<i32>} : memref<128x8xbf16, #tpu.memory_space<vmem>>, vector<128x8xbf16>,
    return
  }
  func.func @transform_0(%arg0: i32) -> (i32, i32) {
    %c0_i32 = arith.constant 0 : i32
    %c0_i32_0 = arith.constant 0 : i32
    return %arg0, %c0_i32 : i32, i32
  }
  func.func @transform_1(%arg0: i32) -> (i32, i32) {
    %c0_i32 = arith.constant 0 : i32
    %c0_i32_0 = arith.constant 0 : i32
    %c0_i32_1 = arith.constant 0 : i32
    return %c0_i32, %c0_i32_0 : i32, i32
  }
  func.func @transform_2(%arg0: i32) -> (i32, i32) {
    %c0_i32 = arith.constant 0 : i32
    %c0_i32_0 = arith.constant 0 : i32
    %c0_i32_1 = arith.constant 0 : i32
    return %c0_i32, %c0_i32_0 : i32, i32
  }
  func.func @transform_3(%arg0: i32) -> (i32, i32) {
    %c0_i32 = arith.constant 0 : i32
    %c0_i32_0 = arith.constant 0 : i32
    return %arg0, %c0_i32 : i32, i32
  }
}

</mosaic_0001>

<bundles_post_ra>
// kernel: tpu_custom_call.1
= control target key start
LH: loop header
LB: loop body
LE: loop exit
PB: predicated region body
PF: predicated region fallthrough
CT: control target
= control target key end

     0   :  { %vm83_vm0 = vcmask 130048   ;;  %vm189_vm1 = vcmask 60416   ;;  %s407_s1 = inlined_call_operand.vmem [shape: bf16[16,8], index: 1, kind: input, shape index: {}]   ;;  %s408_s0 = inlined_call_operand.vmem [shape: bf16[128,16], index: 0, kind: input, shape index: {}]   ;;  %s409_s2 = inlined_call_operand.vmem [shape: f32[1,8], index: 2, kind: input, shape index: {}]   ;;  %s410_s3 = inlined_call_operand.vmem [shape: bf16[128,8], index: 3, kind: output, shape index: {}]  }
   0x1   :  { %v262_v0 = vld [vmem:[%s407_s1] sm:$0xff]  ;;  %v256_v2 = vld [vmem:[%s408_s0 + $0x10] sm:$0xff]  ;;  %v255_v5 = vld [vmem:[%s408_s0 + $0x8] sm:$0xff] }
   0x2   :  { %v254_v1 = vld [vmem:[%s408_s0] sm:$0xff]  ;;  %115 = vmatpush.bf16.msra.mxu0 %v262_v0  ;;  %263 = vmatpush.bf16.msra.mxu1 %v262_v0  ;;  %v260_v4 = vld [vmem:[%s408_s0 + $0x30] sm:$0xff]  ;;  %v257_v6 = vld [vmem:[%s408_s0 + $0x18] sm:$0xff] }
   0x3   :  { %v258_v3 = vld [vmem:[%s408_s0 + $0x20] sm:$0xff]  ;;  %264 = vmatpush.bf16.msra.mxu2 %v262_v0  ;;  %265 = vmatpush.bf16.msra.mxu3 %v262_v0  ;;  %v259_v7 = vld [vmem:[%s408_s0 + $0x28] sm:$0xff]  ;;  %v261_v8 = vld [vmem:[%s408_s0 + $0x38] sm:$0xff] }
   0x4   :  { %v325_v9 = vld [vmem:[%s409_s2] ss:$0 sm:$0xff] }
   0x5   :  { %246 = vmatmul.msk.bf16.vlgmr.msra.gmra.mxu0 %vm83_vm0, %v254_v1  ;;  %248 = vmatmul.msk.bf16.vlgmr.msra.gmra.mxu1 %vm83_vm0, %v256_v2 }
   0x6   :  { %250 = vmatmul.msk.bf16.vlgmr.msra.gmra.mxu2 %vm83_vm0, %v258_v3  ;;  %252 = vmatmul.msk.bf16.vlgmr.msra.gmra.mxu3 %vm83_vm0, %v260_v4 }
  0x15   :  { %247 = vmatmul.msk.bf16.gmra.mxu0 %vm83_vm0, %v255_v5  ;;  %249 = vmatmul.msk.bf16.gmra.mxu1 %vm83_vm0, %v257_v6 }
  0x16   :  { %251 = vmatmul.msk.bf16.gmra.mxu2 %vm83_vm0, %v259_v7  ;;  %253 = vmatmul.msk.bf16.gmra.mxu3 %vm83_vm0, %v261_v8 }
  0x82   :  { %v117_v10 = vpop.f32.mrf.mxu0  ;;  %v127_v11 = vpop.f32.mrf.mxu1 }
  0x83   :  { %v118_v12 = vadd.f32 %v325_v9, %v117_v10  ;;  %v128_v13 = vadd.f32 %v325_v9, %v127_v11 }
  0x85   :  { %v157_v14 = vmax.f32 %v118_v12, 0.0  ;;  %v161_v15 = vmax.f32 %v128_v13, 0.0 }
  0x87   :  { %v173_v16 = vpack.c.bf16 %v157_v14, %v157_v14  ;;  %v177_v17 = vpack.c.bf16 %v161_v15, %v161_v15 }
  0x89   :  { %190 = vst.msk [vmem:[%s410_s3] sm:$0xf] %vm189_vm1, %v173_v16  ;;  %v137_v18 = vpop.f32.mrf.mxu2  ;;  %v147_v19 = vpop.f32.mrf.mxu3 }
  0x8a   :  { %194 = vst.msk [vmem:[%s410_s3 + $0x10] sm:$0xf] %vm189_vm1, %v177_v17  ;;  %v138_v20 = vadd.f32 %v325_v9, %v137_v18  ;;  %v148_v21 = vadd.f32 %v325_v9, %v147_v19  ;;  %v119_v22 = vpop.f32.mrf.mxu0  ;;  %v129_v23 = vpop.f32.mrf.mxu1 }
  0x8b   :  { %v120_v24 = vadd.f32 %v325_v9, %v119_v22  ;;  %v130_v25 = vadd.f32 %v325_v9, %v129_v23 }
  0x8c   :  { %v165_v26 = vmax.f32 %v138_v20, 0.0  ;;  %v169_v27 = vmax.f32 %v148_v21, 0.0 }
  0x8d   :  { %v158_v28 = vmax.f32 %v120_v24, 0.0  ;;  %v162_v29 = vmax.f32 %v130_v25, 0.0 }
  0x8e   :  { %v181_v30 = vpack.c.bf16 %v165_v26, %v165_v26  ;;  %v185_v31 = vpack.c.bf16 %v169_v27, %v169_v27 }
  0x8f   :  { %v174_v32 = vpack.c.bf16 %v158_v28, %v158_v28  ;;  %v178_v33 = vpack.c.bf16 %v162_v29, %v162_v29 }
  0x90   :  { %198 = vst.msk [vmem:[%s410_s3 + $0x20] sm:$0xf] %vm189_vm1, %v181_v30 }
  0x91   :  { %202 = vst.msk [vmem:[%s410_s3 + $0x30] sm:$0xf] %vm189_vm1, %v185_v31  ;;  %v139_v34 = vpop.f32.mrf.mxu2  ;;  %v149_v35 = vpop.f32.mrf.mxu3 }
  0x92   :  { %191 = vst.msk [vmem:[%s410_s3 + $0x4] sm:$0xf] %vm189_vm1, %v174_v32  ;;  %v140_v36 = vadd.f32 %v325_v9, %v139_v34  ;;  %v150_v37 = vadd.f32 %v325_v9, %v149_v35  ;;  %v122_v38 = vpop.f32.mrf.mxu0  ;;  %v132_v39 = vpop.f32.mrf.mxu1 }
  0x93   :  { %195 = vst.msk [vmem:[%s410_s3 + $0x14] sm:$0xf] %vm189_vm1, %v178_v33  ;;  %v123_v40 = vadd.f32 %v325_v9, %v122_v38  ;;  %v133_v41 = vadd.f32 %v325_v9, %v132_v39 }
  0x94   :  { %v166_v42 = vmax.f32 %v140_v36, 0.0  ;;  %v170_v43 = vmax.f32 %v150_v37, 0.0 }
  0x95   :  { %v159_v44 = vmax.f32 %v123_v40, 0.0  ;;  %v163_v45 = vmax.f32 %v133_v41, 0.0 }
  0x96   :  { %v182_v46 = vpack.c.bf16 %v166_v42, %v166_v42  ;;  %v186_v47 = vpack.c.bf16 %v170_v43, %v170_v43 }
  0x97   :  { %v175_v48 = vpack.c.bf16 %v159_v44, %v159_v44  ;;  %v179_v49 = vpack.c.bf16 %v163_v45, %v163_v45 }
  0x98   :  { %199 = vst.msk [vmem:[%s410_s3 + $0x24] sm:$0xf] %vm189_vm1, %v182_v46 }
  0x99   :  { %203 = vst.msk [vmem:[%s410_s3 + $0x34] sm:$0xf] %vm189_vm1, %v186_v47  ;;  %v142_v50 = vpop.f32.mrf.mxu2  ;;  %v152_v51 = vpop.f32.mrf.mxu3 }
  0x9a   :  { %192 = vst.msk [vmem:[%s410_s3 + $0x8] sm:$0xf] %vm189_vm1, %v175_v48  ;;  %v143_v52 = vadd.f32 %v325_v9, %v142_v50  ;;  %v153_v53 = vadd.f32 %v325_v9, %v152_v51  ;;  %v124_v54 = vpop.f32.mrf.mxu0  ;;  %v134_v55 = vpop.f32.mrf.mxu1 }
  0x9b   :  { %196 = vst.msk [vmem:[%s410_s3 + $0x18] sm:$0xf] %vm189_vm1, %v179_v49  ;;  %v125_v56 = vadd.f32 %v325_v9, %v124_v54  ;;  %v135_v57 = vadd.f32 %v325_v9, %v134_v55 }
  0x9c   :  { %v167_v58 = vmax.f32 %v143_v52, 0.0  ;;  %v171_v59 = vmax.f32 %v153_v53, 0.0 }
  0x9d   :  { %v160_v60 = vmax.f32 %v125_v56, 0.0  ;;  %v164_v61 = vmax.f32 %v135_v57, 0.0 }
  0x9e   :  { %v183_v62 = vpack.c.bf16 %v167_v58, %v167_v58  ;;  %v187_v63 = vpack.c.bf16 %v171_v59, %v171_v59 }
  0x9f   :  { %v176_v0 = vpack.c.bf16 %v160_v60, %v160_v60  ;;  %v180_v1 = vpack.c.bf16 %v164_v61, %v164_v61 }
  0xa0   :  { %200 = vst.msk [vmem:[%s410_s3 + $0x28] sm:$0xf] %vm189_vm1, %v183_v62 }
  0xa1   :  { %204 = vst.msk [vmem:[%s410_s3 + $0x38] sm:$0xf] %vm189_vm1, %v187_v63  ;;  %v144_v2 = vpop.f32.mrf.mxu2  ;;  %v154_v3 = vpop.f32.mrf.mxu3 }
  0xa2   :  { %193 = vst.msk [vmem:[%s410_s3 + $0xc] sm:$0xf] %vm189_vm1, %v176_v0  ;;  %v145_v4 = vadd.f32 %v325_v9, %v144_v2  ;;  %v155_v5 = vadd.f32 %v325_v9, %v154_v3 }
  0xa3   :  { %197 = vst.msk [vmem:[%s410_s3 + $0x1c] sm:$0xf] %vm189_vm1, %v180_v1 }
  0xa4   :  { %v168_v6 = vmax.f32 %v145_v4, 0.0  ;;  %v172_v7 = vmax.f32 %v155_v5, 0.0 }
  0xa6   :  { %v184_v8 = vpack.c.bf16 %v168_v6, %v168_v6  ;;  %v188_v10 = vpack.c.bf16 %v172_v7, %v172_v7 }
  0xa8   :  { %201 = vst.msk [vmem:[%s410_s3 + $0x2c] sm:$0xf] %vm189_vm1, %v184_v8 }
  0xa9   :  { %205 = vst.msk [vmem:[%s410_s3 + $0x3c] sm:$0xf] %vm189_vm1, %v188_v10 }

</bundles_post_ra>
